<compile_context>
chip_gen: v6e
topology: v6e:2x2x1
jax: 0.10.0
libtpu: 0.0.40
codegen_flags: <defaults>
</compile_context>

<pallas_src>
import functools

import jax
import jax.numpy as jnp
from jax.experimental import pallas as pl
from jax.experimental.pallas import tpu as pltpu

_LANES = 128
_SUBLANES = 8


def _round_up(n, m):
    return (n + m - 1) // m * m


def _dqn_kernel(x_ref, w1_ref, w2_ref, w3_ref, b_ref, o_ref, *,
                hidden_size, action_pad, action_size):
    # Dropout layers are identity in eval mode.
    x = x_ref[...].astype(jnp.bfloat16)

    # Stacked biases: row 0 -> b1, row 1 -> b2, row 2 -> b3 (lane padded).
    b1 = b_ref[0:1, 0:hidden_size]
    b2 = b_ref[1:2, 0:hidden_size]
    b3 = b_ref[2:3, 0:action_pad]

    # Layer 1: Linear (bf16 x bf16 -> f32 acc) + bias + ReLU.
    h1 = jnp.dot(x, w1_ref[...], preferred_element_type=jnp.float32) + b1
    h1 = jnp.maximum(h1, 0.0)

    # Layer 2: Linear + bias + ReLU.
    h2 = jnp.dot(h1.astype(jnp.bfloat16), w2_ref[...],
                 preferred_element_type=jnp.float32) + b2
    h2 = jnp.maximum(h2, 0.0)

    # Layer 3: Q head. Computed with the 128-lane padded W3 (MXU friendly),
    # but only the real action columns are written back to HBM.
    out = jnp.dot(h2.astype(jnp.bfloat16), w3_ref[...],
                  preferred_element_type=jnp.float32) + b3
    o_ref[...] = out[:, 0:action_size].astype(o_ref.dtype)


def prepare_params(params):
    """One-time conversion: bf16 weights, lane-padded W3, stacked f32 biases."""
    w1, b1, w2, b2, w3, b3 = params
    state_size, hidden_size = w1.shape
    action_size = w3.shape[1]
    action_pad = _round_up(action_size, _LANES)
    bias_cols = _round_up(max(hidden_size, action_size), _LANES)

    w1b = w1.astype(jnp.bfloat16)
    w2b = w2.astype(jnp.bfloat16)
    w3b = jnp.pad(w3.astype(jnp.bfloat16),
                  ((0, 0), (0, action_pad - action_size)))

    def _row(b, n):
        b = jnp.reshape(b.astype(jnp.float32), (1, n))
        return jnp.pad(b, ((0, 0), (0, bias_cols - n)))

    b_all = jnp.concatenate(
        [_row(b1, hidden_size), _row(b2, hidden_size), _row(b3, action_size)],
        axis=0)

    return dict(w1=w1b, w2=w2b, w3=w3b, b=b_all,
                state_size=state_size, hidden_size=hidden_size,
                action_size=action_size, action_pad=action_pad)


def _tile_plan(batch, tile_batch):
    """Balanced batch tiling; >=2 tiles for large batches (v7x megacore)."""
    b8 = _round_up(batch, _SUBLANES)
    num_tiles = max(1, pl.cdiv(b8, int(tile_batch)))
    # v7x has 2 TensorCores: give the "parallel" axis at least 2 grid points
    # whenever there is enough work to split.
    if num_tiles == 1 and b8 >= 512:
        num_tiles = 2
    tb = _round_up(pl.cdiv(b8, num_tiles), _SUBLANES)
    return tb, num_tiles, num_tiles * tb


def dqn_forward(x, prepared, *, tile_batch=1024):
    """Fused MLP forward. x: [B, state_size] f32. Returns [B, action_size] f32."""
    state_size = prepared["state_size"]
    hidden_size = prepared["hidden_size"]
    action_size = prepared["action_size"]
    action_pad = prepared["action_pad"]
    bias_cols = prepared["b"].shape[1]

    batch = x.shape[0]
    tb, num_tiles, b_pad = _tile_plan(batch, tile_batch)
    if b_pad != batch:
        x = jnp.pad(x, ((0, b_pad - batch), (0, 0)))

    const2 = lambda i: (0, 0)
    in_specs = [
        pl.BlockSpec((tb, state_size), lambda i: (i, 0)),     # x tile (pipelined)
        pl.BlockSpec((state_size, hidden_size), const2),      # W1 (grid-invariant)
        pl.BlockSpec((hidden_size, hidden_size), const2),     # W2
        pl.BlockSpec((hidden_size, action_pad), const2),      # W3 (lane-padded)
        pl.BlockSpec((3, bias_cols), const2),                 # stacked biases
    ]
    # Narrow output block: last dim equals full array dim (action_size).
    out_spec = pl.BlockSpec((tb, action_size), lambda i: (i, 0))

    flops = 2 * b_pad * (state_size * hidden_size
                         + hidden_size * hidden_size
                         + hidden_size * action_pad)
    bytes_accessed = (
        b_pad * state_size * 4                                     # x (f32)
        + (prepared["w1"].size + prepared["w2"].size
           + prepared["w3"].size) * 2                              # bf16 weights
        + prepared["b"].size * 4                                   # f32 biases
        + b_pad * action_size * 4)                                 # narrow output

    kernel = functools.partial(_dqn_kernel, hidden_size=hidden_size,
                               action_pad=action_pad, action_size=action_size)

    out = pl.pallas_call(
        kernel,
        out_shape=jax.ShapeDtypeStruct((b_pad, action_size), jnp.float32),
        grid_spec=pltpu.PrefetchScalarGridSpec(
            num_scalar_prefetch=0,
            grid=(num_tiles,),
            in_specs=in_specs,
            out_specs=out_spec,
        ),
        compiler_params=pltpu.CompilerParams(
            dimension_semantics=("parallel",),   # batch tiles shard across TCs (v7x)
            vmem_limit_bytes=32 * 1024 * 1024,
        ),
        cost_estimate=pl.CostEstimate(
            flops=int(flops),
            transcendentals=0,
            bytes_accessed=int(bytes_accessed),
        ),
    )(x, prepared["w1"], prepared["w2"], prepared["w3"], prepared["b"])

    return out[:batch]


def init_params(key, state_size, hidden_size, action_size):
    """Deterministic init (uniform, PyTorch-Linear-like fan_in scaling)."""
    ks = jax.random.split(key, 6)

    def lin(kw, kb, fan_in, fan_out):
        bound = 1.0 / jnp.sqrt(fan_in)
        w = jax.random.uniform(kw, (fan_in, fan_out), jnp.float32, -bound, bound)
        b = jax.random.uniform(kb, (1, fan_out), jnp.float32, -bound, bound)
        return w, b

    w1, b1 = lin(ks[0], ks[1], state_size, hidden_size)
    w2, b2 = lin(ks[2], ks[3], hidden_size, hidden_size)
    w3, b3 = lin(ks[4], ks[5], hidden_size, action_size)
    return (w1, b1, w2, b2, w3, b3)


if __name__ == "__main__":
    key = jax.random.PRNGKey(0)
    k_x, k_p = jax.random.split(key)

    batch = 8
    state_size = 16
    hidden_size = 128
    action_size = 4

    x = jax.random.normal(k_x, (batch, state_size), dtype=jnp.float32)
    params = init_params(k_p, state_size, hidden_size, action_size)
    prepared = prepare_params(params)   # one-time weight cast/pad (hoisted)

    out = jax.block_until_ready(dqn_forward(x, prepared))

    # Reference in plain JAX mirroring the kernel's bf16-weight / f32-acc math.
    w1, b1, w2, b2, w3, b3 = params
    h1 = jnp.maximum(
        jnp.dot(x.astype(jnp.bfloat16), w1.astype(jnp.bfloat16),
                preferred_element_type=jnp.float32) + b1, 0.0)
    h2 = jnp.maximum(
        jnp.dot(h1.astype(jnp.bfloat16), w2.astype(jnp.bfloat16),
                preferred_element_type=jnp.float32) + b2, 0.0)
    ref = jnp.dot(h2.astype(jnp.bfloat16), w3.astype(jnp.bfloat16),
                  preferred_element_type=jnp.float32) + b3

    assert out.shape == (batch, action_size)
    assert jnp.allclose(out, ref, atol=1e-3, rtol=1e-3)

    print("KERNEL_OK")
</pallas_src>

<mosaic_0001>
module attributes {stable_mosaic.version = 11 : i64} {
  func.func @_dqn_kernel(%arg0: i32, %arg1: memref<8x16xf32, #tpu.memory_space<vmem>>, %arg2: memref<16x128xbf16, #tpu.memory_space<vmem>>, %arg3: memref<128x128xbf16, #tpu.memory_space<vmem>>, %arg4: memref<128x128xbf16, #tpu.memory_space<vmem>>, %arg5: memref<3x128xf32, #tpu.memory_space<vmem>>, %arg6: memref<8x4xf32, #tpu.memory_space<vmem>>) attributes {dimension_semantics = [#tpu.dimension_semantics<parallel>], iteration_bounds = array<i64: 1>, scalar_prefetch = 0 : i64, scratch_operands = 0 : i64, tpu.core_type = #tpu.core_type<tc>, window_params = [{transform_indices = @transform_0, window_bounds = array<i64: 8, 16>}, {pipeline_mode = #tpu.pipeline_mode<synchronous>, transform_indices = @transform_1, window_bounds = array<i64: 16, 128>}, {pipeline_mode = #tpu.pipeline_mode<synchronous>, transform_indices = @transform_2, window_bounds = array<i64: 128, 128>}, {pipeline_mode = #tpu.pipeline_mode<synchronous>, transform_indices = @transform_3, window_bounds = array<i64: 128, 128>}, {pipeline_mode = #tpu.pipeline_mode<synchronous>, transform_indices = @transform_4, window_bounds = array<i64: 3, 128>}, {transform_indices = @transform_5, window_bounds = array<i64: 8, 4>}]} {
    %c0 = arith.constant 0 : index
    %c0_0 = arith.constant 0 : index
    %0 = vector.load %arg1[%c0, %c0_0] : memref<8x16xf32, #tpu.memory_space<vmem>>, vector<8x16xf32>
    %1 = arith.truncf %0 : vector<8x16xf32> to vector<8x16xbf16>
    %c0_1 = arith.constant 0 : index
    %c0_2 = arith.constant 0 : index
    %2 = vector.load %arg5[%c0_1, %c0_2] : memref<3x128xf32, #tpu.memory_space<vmem>>, vector<1x128xf32>
    %c1 = arith.constant 1 : index
    %c0_3 = arith.constant 0 : index
    %3 = vector.load %arg5[%c1, %c0_3] : memref<3x128xf32, #tpu.memory_space<vmem>>, vector<1x128xf32>
    %c2 = arith.constant 2 : index
    %c0_4 = arith.constant 0 : index
    %4 = vector.load %arg5[%c2, %c0_4] : memref<3x128xf32, #tpu.memory_space<vmem>>, vector<1x128xf32>
    %c0_5 = arith.constant 0 : index
    %c0_6 = arith.constant 0 : index
    %5 = vector.load %arg2[%c0_5, %c0_6] : memref<16x128xbf16, #tpu.memory_space<vmem>>, vector<16x128xbf16>
    %cst = arith.constant dense<0.000000e+00> : vector<8x128xf32>
    %6 = tpu.matmul %1, %5, %cst {dimension_numbers = #tpu.dot_dimension_numbers<[1], [0], [0], [1], [0, 0, 1, 1], [], []>} : vector<8x16xbf16>, vector<16x128xbf16>, vector<8x128xf32> -> vector<8x128xf32>
    %7 = vector.broadcast %2 : vector<1x128xf32> to vector<8x128xf32>
    %8 = arith.addf %6, %7 : vector<8x128xf32>
    %cst_7 = arith.constant 0.000000e+00 : f32
    %9 = vector.broadcast %cst_7 : f32 to vector<8x128xf32>
    %10 = arith.maximumf %8, %9 : vector<8x128xf32>
    %11 = arith.truncf %10 : vector<8x128xf32> to vector<8x128xbf16>
    %c0_8 = arith.constant 0 : index
    %c0_9 = arith.constant 0 : index
    %12 = vector.load %arg3[%c0_8, %c0_9] : memref<128x128xbf16, #tpu.memory_space<vmem>>, vector<128x128xbf16>
    %cst_10 = arith.constant dense<0.000000e+00> : vector<8x128xf32>
    %13 = tpu.matmul %11, %12, %cst_10 {dimension_numbers = #tpu.dot_dimension_numbers<[1], [0], [0], [1], [0, 0, 1, 1], [], []>} : vector<8x128xbf16>, vector<128x128xbf16>, vector<8x128xf32> -> vector<8x128xf32>
    %14 = vector.broadcast %3 : vector<1x128xf32> to vector<8x128xf32>
    %15 = arith.addf %13, %14 : vector<8x128xf32>
    %cst_11 = arith.constant 0.000000e+00 : f32
    %16 = vector.broadcast %cst_11 : f32 to vector<8x128xf32>
    %17 = arith.maximumf %15, %16 : vector<8x128xf32>
    %18 = arith.truncf %17 : vector<8x128xf32> to vector<8x128xbf16>
    %c0_12 = arith.constant 0 : index
    %c0_13 = arith.constant 0 : index
    %19 = vector.load %arg4[%c0_12, %c0_13] : memref<128x128xbf16, #tpu.memory_space<vmem>>, vector<128x128xbf16>
    %cst_14 = arith.constant dense<0.000000e+00> : vector<8x128xf32>
    %20 = tpu.matmul %18, %19, %cst_14 {dimension_numbers = #tpu.dot_dimension_numbers<[1], [0], [0], [1], [0, 0, 1, 1], [], []>} : vector<8x128xbf16>, vector<128x128xbf16>, vector<8x128xf32> -> vector<8x128xf32>
    %21 = vector.broadcast %4 : vector<1x128xf32> to vector<8x128xf32>
    %22 = arith.addf %20, %21 : vector<8x128xf32>
    %23 = vector.extract_strided_slice %22 {offsets = [0, 0], sizes = [8, 4], strides = [1, 1]} : vector<8x128xf32> to vector<8x4xf32>
    %c0_15 = arith.constant 0 : index
    %c0_16 = arith.constant 0 : index
    %24 = vector.load %arg6[%c0_15, %c0_16] : memref<8x4xf32, #tpu.memory_space<vmem>>, vector<8x4xf32>
    tpu.vector_store %arg6[%c0_15, %c0_16], %23 {strides = array<i32>} : memref<8x4xf32, #tpu.memory_space<vmem>>, vector<8x4xf32>,
    return
  }
  func.func @transform_0(%arg0: i32) -> (i32, i32) {
    %c0_i32 = arith.constant 0 : i32
    %c0_i32_0 = arith.constant 0 : i32
    return %arg0, %c0_i32 : i32, i32
  }
  func.func @transform_1(%arg0: i32) -> (i32, i32) {
    %c0_i32 = arith.constant 0 : i32
    %c0_i32_0 = arith.constant 0 : i32
    %c0_i32_1 = arith.constant 0 : i32
    return %c0_i32, %c0_i32_0 : i32, i32
  }
  func.func @transform_2(%arg0: i32) -> (i32, i32) {
    %c0_i32 = arith.constant 0 : i32
    %c0_i32_0 = arith.constant 0 : i32
    %c0_i32_1 = arith.constant 0 : i32
    return %c0_i32, %c0_i32_0 : i32, i32
  }
  func.func @transform_3(%arg0: i32) -> (i32, i32) {
    %c0_i32 = arith.constant 0 : i32
    %c0_i32_0 = arith.constant 0 : i32
    %c0_i32_1 = arith.constant 0 : i32
    return %c0_i32, %c0_i32_0 : i32, i32
  }
  func.func @transform_4(%arg0: i32) -> (i32, i32) {
    %c0_i32 = arith.constant 0 : i32
    %c0_i32_0 = arith.constant 0 : i32
    %c0_i32_1 = arith.constant 0 : i32
    return %c0_i32, %c0_i32_0 : i32, i32
  }
  func.func @transform_5(%arg0: i32) -> (i32, i32) {
    %c0_i32 = arith.constant 0 : i32
    %c0_i32_0 = arith.constant 0 : i32
    return %arg0, %c0_i32 : i32, i32
  }
}

</mosaic_0001>

<bundles_post_ra>
// kernel: tpu_custom_call.1
= control target key start
LH: loop header
LB: loop body
LE: loop exit
PB: predicated region body
PF: predicated region fallthrough
CT: control target
= control target key end

     0   :  { %10 = vsyncpa [#allocation3], 0  ;;  %s653_s0 = inlined_call_operand.hbm [shape: f32[8,16], index: 0, kind: input, shape index: {}]   ;;  %s654_s1 = inlined_call_operand.hbm [shape: bf16[16,128], index: 1, kind: input, shape index: {}]   ;;  %s655_s2 = inlined_call_operand.hbm [shape: bf16[128,128], index: 2, kind: input, shape index: {}]   ;;  %s656_s3 = inlined_call_operand.hbm [shape: bf16[128,128], index: 3, kind: input, shape index: {}]   ;;  %s657_s4 = inlined_call_operand.vmem [shape: f32[3,128], index: 4, kind: input, shape index: {}]   ;;  %s658_s5 = inlined_call_operand.vmem [shape: f32[8,4], index: 5, kind: output, shape index: {}]  }
   0x1   :  { %11 = vsyncpa [#allocation5], 0 }
   0x2   :  { %12 = vsyncpa [#allocation8], 0  ;;  %s562_s18 = smov [#allocation4]  }
   0x3   :  { %s28_s19 = sshll.u32 %s562_s18, 4  ;;  %s29_s19 = int_to_ptr.vmem [resolvable:$true] %s28_s19 }
   0x4   :  { %s484_s20 = scalar_lea.vmem %s29_s19, 128  ;;  %p489_p1 = scmp.lt.s32.totalorder %s29_s19, %s29_s19 }
   0x5   :  { %p485_p0 = scmp.ne.s32.totalorder %s29_s19, %s484_s20  ;;  %p490_p2 = scmp.lt.s32.totalorder %s484_s20, %s484_s20 }
   0x7   :  { %p491_p3 = por %p490_p2, %p489_p1 }
   0x9   :  { %p492_p4 = pnand %p491_p3, %p485_p0 }
   0xb   :  { %495 = shalt.err (!%p492_p4)
}
   0xc   :  { %s563_s21 = smov 64   ;;  %s564_s22 = smov 4  }
   0xd   :  { %34 = dma.hbm_to_vmem [thread:$0]  %s654_s1, 128, %s29_s19, [#allocation5], %s563_s21, %s563_s21, %s564_s22  }
   0xe   :  { %s565_s25 = smov [#allocation2]   ;;  %s566_s27 = smov [#allocation6]  }
   0xf   :  { %s19_s26 = sshll.u32 %s565_s25, 4  ;;  %s40_s28 = sshll.u32 %s566_s27, 4  ;;  %s20_s26 = int_to_ptr.vmem [resolvable:$true] %s19_s26  ;;  %s41_s28 = int_to_ptr.vmem [resolvable:$true] %s40_s28 }
  0x10   :  { %s504_s29 = scalar_lea.vmem %s20_s26, 128  ;;  %p509_p6 = scmp.lt.s32.totalorder %s20_s26, %s20_s26 }
  0x11   :  { %p505_p5 = scmp.ne.s32.totalorder %s20_s26, %s504_s29  ;;  %p510_p7 = scmp.lt.s32.totalorder %s504_s29, %s504_s29 }
  0x13   :  { %p511_p8 = por %p510_p7, %p509_p6 }
  0x15   :  { %p512_p9 = pnand %p511_p8, %p505_p5 }
  0x17   :  { %515 = shalt.err (!%p512_p9)
}
  0x18   :  { %22 = dma.hbm_to_vmem [thread:$0]  %s653_s0, 128, %s20_s26, [#allocation3]  }
  0x19   :  { %s524_s7 = scalar_lea.vmem %s41_s28, 1024  ;;  %p529_p11 = scmp.lt.s32.totalorder %s41_s28, %s41_s28 }
  0x1a   :  { %p525_p10 = scmp.ne.s32.totalorder %s41_s28, %s524_s7  ;;  %p530_p12 = scmp.lt.s32.totalorder %s524_s7, %s524_s7 }
  0x1c   :  { %p531_p13 = por %p530_p12, %p529_p11 }
  0x1e   :  { %p532_p0 = pnand %p531_p13, %p525_p10 }
  0x20   :  { %535 = shalt.err (!%p532_p0)
}
  0x21   :  { %46 = dma.hbm_to_vmem [thread:$0]  %s655_s2, 1024, %s41_s28, [#allocation5], %s563_s21, %s563_s21, %s564_s22  }
  0x22   :  { %s567_s9 = smov [#allocation7]  }
  0x23   :  { %s52_s10 = sshll.u32 %s567_s9, 4  ;;  %s53_s10 = int_to_ptr.vmem [resolvable:$true] %s52_s10 }
  0x24   :  { %s544_s11 = scalar_lea.vmem %s53_s10, 1024  ;;  %p549_p2 = scmp.lt.s32.totalorder %s53_s10, %s53_s10 }
  0x25   :  { %p545_p1 = scmp.ne.s32.totalorder %s53_s10, %s544_s11  ;;  %p550_p3 = scmp.lt.s32.totalorder %s544_s11, %s544_s11 }
  0x27   :  { %p551_p4 = por %p550_p3, %p549_p2 }
  0x29   :  { %p552_p5 = pnand %p551_p4, %p545_p1 }
  0x2b   :  { %555 = shalt.err (!%p552_p5)
}
  0x2c   :  { %58 = dma.hbm_to_vmem [thread:$0]  %s656_s3, 1024, %s53_s10, [#allocation8], %s563_s21, %s563_s21, %s564_s22  }
  0x2d   :  { %556 = dma.done.wait [#allocation3], 128  }
  0x2e   :  { %557 = vsyncadd [#allocation3], 4294967168 }
  0x2f   :  { %558 = dma.done.wait [#allocation5], 1152  }
  0x30   :  { %559 = vsyncadd [#allocation5], 4294966144 }
  0x31   :  { %560 = dma.done.wait [#allocation8], 1024  }
  0x32   :  { %561 = vsyncadd [#allocation8], 4294966272  ;;  %v568_v0 = vmov 0.0   ;;  %vm569_vm0 = vmmov 0   ;;  %v459_v1 = vld [vmem:[#allocation4] sm:$0xff]   ;;  %v74_v2 = vld [vmem:[#allocation2] sm:$0xff] }
  0x33   :  { %405 = vmatprep.subr.bf16.mxu0 %v568_v0  ;;  %407 = vmatprep.mubr.msk.bf16.mxu0 %vm569_vm0, %v568_v0  ;;  %v75_v3 = vpack.c.bf16 %v74_v2, %v74_v2  ;;  %vm91_vm1 = vcmask 130048   ;;  %v460_v4 = vld [vmem:[#allocation6 + $0x38] sm:$0xff]   ;;  %v461_v5 = vld [vmem:[#allocation6 + $0x30] sm:$0xff]   ;;  %v462_v6 = vld [vmem:[#allocation6 + $0x28] sm:$0xff]   ;;  %vm355_vm2 = vcmask 31744  }
  0x34   :  { %411 = vmatprep.subr.bf16.mxu1 %v568_v0  ;;  %427 = vmatprep.mubr.msk.bf16.mxu1 %vm569_vm0, %v568_v0  ;;  %v463_v7 = vld [vmem:[#allocation6 + $0x20] sm:$0xff]   ;;  %v464_v8 = vld [vmem:[#allocation6 + $0x18] sm:$0xff]   ;;  %v465_v9 = vld [vmem:[#allocation6 + $0x10] sm:$0xff]  }
  0x35   :  { %406 = vmatpush3.bf16.msra.mxu0 %v459_v1  ;;  %412 = vmatpush3.bf16.msra.mxu1 %v460_v4  ;;  %v466_v10 = vld [vmem:[#allocation6 + $0x8] sm:$0xff]   ;;  %v467_v11 = vld [vmem:[#allocation6] sm:$0xff]   ;;  %v468_v12 = vld [vmem:[#allocation7 + $0x38] sm:$0xff]  }
  0x36   :  { %431 = vmatprep.subr.bf16.mxu0 %v568_v0  ;;  %413 = vmatprep.subr.bf16.mxu1 %v568_v0  ;;  %v469_v13 = vld [vmem:[#allocation7 + $0x30] sm:$0xff]   ;;  %v470_v14 = vld [vmem:[#allocation7 + $0x28] sm:$0xff]   ;;  %v471_v15 = vld [vmem:[#allocation7 + $0x20] sm:$0xff]  }
  0x37   :  { %v472_v16 = vld [vmem:[#allocation7 + $0x18] sm:$0xff]   ;;  %v473_v17 = vld [vmem:[#allocation7 + $0x10] sm:$0xff]   ;;  %v474_v26 = vld [vmem:[#allocation7 + $0x8] sm:$0xff]  }
  0x38   :  { %408 = vmatmul.mubr.msk.bf16.vlgmr.msra.gmra.mxu0 %vm91_vm1, %v75_v3  ;;  %v364_v18 = vld [vmem:[%s657_s4] ss:$0 sm:$0xff]  ;;  %v475_v27 = vld [vmem:[#allocation7] sm:$0xff]   ;;  %v367_v28 = vld [vmem:[%s657_s4 + $0x1] ss:$0 sm:$0xff] }
  0x39   :  { %447 = vmatprep.mubr.msk.bf16.mxu0 %vm569_vm0, %v568_v0  ;;  %414 = vmatpush3.bf16.msra.mxu1 %v461_v5  ;;  %v376_v36 = vld [vmem:[%s657_s4 + $0x2] ss:$0 sm:$0xff] }
  0x3a   :  { %415 = vmatprep.subr.bf16.mxu1 %v568_v0  ;;  %432 = vmatpush3.bf16.msra.mxu0 %v468_v12 }
  0x3b   :  { %433 = vmatprep.subr.bf16.mxu0 %v568_v0 }
  0x3d   :  { %416 = vmatpush3.bf16.msra.mxu1 %v462_v6 }
  0x3e   :  { %417 = vmatprep.subr.bf16.mxu1 %v568_v0  ;;  %434 = vmatpush3.bf16.msra.mxu0 %v469_v13 }
  0x3f   :  { %435 = vmatprep.subr.bf16.mxu0 %v568_v0 }
  0x41   :  { %418 = vmatpush3.bf16.msra.mxu1 %v463_v7 }
  0x42   :  { %419 = vmatprep.subr.bf16.mxu1 %v568_v0  ;;  %436 = vmatpush3.bf16.msra.mxu0 %v470_v14 }
  0x43   :  { %437 = vmatprep.subr.bf16.mxu0 %v568_v0 }
  0x45   :  { %420 = vmatpush3.bf16.msra.mxu1 %v464_v8 }
  0x46   :  { %421 = vmatprep.subr.bf16.mxu1 %v568_v0  ;;  %438 = vmatpush3.bf16.msra.mxu0 %v471_v15 }
  0x47   :  { %439 = vmatprep.subr.bf16.mxu0 %v568_v0 }
  0x49   :  { %422 = vmatpush3.bf16.msra.mxu1 %v465_v9 }
  0x4a   :  { %423 = vmatprep.subr.bf16.mxu1 %v568_v0  ;;  %440 = vmatpush3.bf16.msra.mxu0 %v472_v16 }
  0x4b   :  { %441 = vmatprep.subr.bf16.mxu0 %v568_v0 }
  0x4d   :  { %424 = vmatpush3.bf16.msra.mxu1 %v466_v10 }
  0x4e   :  { %425 = vmatprep.subr.bf16.mxu1 %v568_v0  ;;  %442 = vmatpush3.bf16.msra.mxu0 %v473_v17 }
  0x4f   :  { %443 = vmatprep.subr.bf16.mxu0 %v568_v0 }
  0x51   :  { %426 = vmatpush3.bf16.msra.mxu1 %v467_v11 }
  0x52   :  { %444 = vmatpush3.bf16.msra.mxu0 %v474_v26 }
  0x53   :  { %445 = vmatprep.subr.bf16.mxu0 %v568_v0 }
  0x56   :  { %446 = vmatpush3.bf16.msra.mxu0 %v475_v27 }
  0xf8   :  { %v129_v19 = vpop.f32.mrf.mxu0 }
  0xf9   :  { %v130_v20 = vadd.f32 %v364_v18, %v129_v19 }
  0xfa   :  { %v409_v21 = vpop.f32.mrf.mxu0 }
  0xfb   :  { %v135_v22 = vmax.f32 %v130_v20, 0.0 }
  0xfc   :  { %v132_v23 = vpop.f32.mrf.mxu0 }
  0xfd   :  { %v136_v24 = vpack.c.bf16 %v135_v22, %v135_v22 }
  0xfe   :  { %v410_v25 = vpop.f32.mrf.mxu0 }
  0xff   :  { %428 = vmatmul.mubr.bf16.vlgmr.msra.gmra.mxu1 %v136_v24 }
 0x1bf   :  { %v239_v29 = vpop.f32.mrf.mxu1 }
 0x1c0   :  { %v240_v30 = vadd.f32 %v367_v28, %v239_v29 }
 0x1c1   :  { %v429_v31 = vpop.f32.mrf.mxu1 }
 0x1c2   :  { %v245_v32 = vmax.f32 %v240_v30, 0.0 }
 0x1c3   :  { %v242_v33 = vpop.f32.mrf.mxu1 }
 0x1c4   :  { %v246_v34 = vpack.c.bf16 %v245_v32, %v245_v32 }
 0x1c5   :  { %v430_v35 = vpop.f32.mrf.mxu1 }
 0x1c6   :  { %448 = vmatmul.mubr.bf16.vlgmr.msra.gmra.mxu0 %v246_v34 }
 0x286   :  { %v349_v37 = vpop.f32.mrf.mxu0 }
 0x287   :  { %v350_v38 = vadd.f32 %v376_v36, %v349_v37 }
 0x288   :  { %v449_v39 = vpop.f32.mrf.mxu0 }
 0x289   :  { %356 = vst.msk [vmem:[%s658_s5] sm:$0xff] %vm355_vm2, %v350_v38 }
 0x28a   :  { %v352_v40 = vpop.f32.mrf.mxu0 }
 0x28c   :  { %v450_v41 = vpop.f32.mrf.mxu0 }
 0x28d   :  { %361 = vsyncpa [#allocation3], 1 }
 0x28e   :  { %362 = vsyncpa [#allocation5], 1 }
 0x28f   :  { %363 = vsyncpa [#allocation8], 1 }

</bundles_post_ra>
